<compile_context>
chip_gen: v5e
topology: v5e:2x2
jax: 0.10.0
libtpu: 0.0.40
codegen_flags: <defaults>
</compile_context>

<pallas_src>
import functools
import math

import jax
import jax.numpy as jnp
import numpy as np
from jax import lax
from jax.experimental import pallas as pl
from jax.experimental.pallas import tpu as pltpu

SCALE = 1
_FSQ_LEVELS = (8, 6, 5)


def _round_up(v, m):
    return (v + m - 1) // m * m


# --------------------------------------------------------------------------- #
# Pallas kernel 1: 3x3 stride-1 "same" conv as one im2col MXU matmul
# --------------------------------------------------------------------------- #
def _conv3x3_kernel(x_ref, w_ref, b_ref, o_ref, *, wp, pre_relu):
    """One grid step (tb samples packed along lanes).

    x_ref: (Cin_p , L_in )  zero-padded images, row-major flattened, one
                            128-aligned slab per sample, + tail pad for taps
    w_ref: (Cout_p, 9*Cin_p) tap-major transposed weights
    b_ref: (Cout_p, 1)       f32 bias
    o_ref: (Cout_p, L_out)   "wide" conv output; valid pixel (r, c) of sample j
                             lives at lane j*slab_r + r*Wp + c
    """
    l_out = o_ref.shape[-1]
    shifts = tuple(di * wp + dj for di in range(3) for dj in range(3))

    x = x_ref[...]                       # storage dtype (bf16 feeds MXU directly)
    if pre_relu:                         # fused ReLU-before-conv (ResidualBlock)
        x = jnp.maximum(x, 0).astype(x.dtype)

    # im2col: tap (di, dj) on a row-major flattened padded image is a lane
    # shift of di*Wp + dj.  One sublane-aligned concat -> single MXU matmul.
    p = jnp.concatenate([x[:, s:s + l_out] for s in shifts], axis=0)
    y = jnp.dot(w_ref[...], p, preferred_element_type=jnp.float32)
    y = y + b_ref[...]                   # bias add in f32
    o_ref[...] = y.astype(o_ref.dtype)   # dense, lane-aligned store


def conv3x3_same(x_nchw, w_hwio, b, *, pre_relu=False, storage_dtype=jnp.float32):
    """NCHW 3x3 stride-1 padding-1 conv (+bias), optional fused ReLU on input."""
    n, cin, h, w = x_nchw.shape
    cout = w_hwio.shape[-1]
    hp, wp = h + 2, w + 2
    cin_p, cout_p = _round_up(cin, 8), _round_up(cout, 8)
    slab = hp * wp
    slab_r = _round_up(slab, 128)              # lane-aligned per-sample slab
    pad_tail = _round_up(2 * wp + 2, 128)      # room for the largest tap shift

    # Samples per grid step: amortize per-step overhead, but keep >= 2 grid
    # steps whenever N >= 2 so v7x's two TensorCores are both busy.
    tb = max(1, min(n, 4096 // slab_r))
    if n >= 2:
        tb = min(tb, pl.cdiv(n, 2))
    nb = pl.cdiv(n, tb)
    n_pad = nb * tb
    l_out = tb * slab_r
    l_in = l_out + pad_tail

    # Input: zero "same" border, flatten spatial row-major, align each slab to
    # 128 lanes, pack tb samples per block along lanes.  NCHW kept end-to-end.
    xp = jnp.pad(x_nchw, ((0, n_pad - n), (0, cin_p - cin), (1, 1), (1, 1)))
    xp = jnp.pad(xp.reshape(n_pad, cin_p, slab), ((0, 0), (0, 0), (0, slab_r - slab)))
    xp = xp.reshape(nb, tb, cin_p, slab_r).transpose(0, 2, 1, 3).reshape(nb, cin_p, l_out)
    xp = jnp.pad(xp, ((0, 0), (0, 0), (0, pad_tail)))

    # Tap-major transposed, channel-padded weights -> (Cout_p, 9*Cin_p).
    wt = jnp.pad(w_hwio, ((0, 0), (0, 0), (0, cin_p - cin), (0, cout_p - cout)))
    wt = wt.reshape(9 * cin_p, cout_p).T
    bp = jnp.pad(b, (0, cout_p - cout)).astype(jnp.float32).reshape(cout_p, 1)

    kernel = functools.partial(_conv3x3_kernel, wp=wp, pre_relu=pre_relu)
    out = pl.pallas_call(
        kernel,
        grid=(nb,),
        in_specs=[
            pl.BlockSpec((None, cin_p, l_in), lambda i: (i, 0, 0)),
            pl.BlockSpec((cout_p, 9 * cin_p), lambda i: (0, 0)),   # fetched once
            pl.BlockSpec((cout_p, 1), lambda i: (0, 0)),           # fetched once
        ],
        out_specs=pl.BlockSpec((None, cout_p, l_out), lambda i: (i, 0, 0)),
        out_shape=jax.ShapeDtypeStruct((nb, cout_p, l_out), storage_dtype),
        compiler_params=pltpu.CompilerParams(
            dimension_semantics=("parallel",),
            vmem_limit_bytes=32 * 1024 * 1024,
        ),
    )(xp.astype(storage_dtype), wt.astype(storage_dtype), bp)

    # Wide output -> valid NCHW region (reshape + slice + cheap transpose only).
    out = out.reshape(nb, cout_p, tb, slab_r).transpose(0, 2, 1, 3)
    out = out.reshape(n_pad, cout_p, slab_r)[:n, :cout, :h * wp]
    return out.reshape(n, cout, h, wp)[..., :w]


# --------------------------------------------------------------------------- #
# Pallas kernel 2: head  ReLU -> Linear(64, 256) -> ReLU
# --------------------------------------------------------------------------- #
def _head_kernel(x_ref, w_ref, b_ref, o_ref):
    x = jnp.maximum(x_ref[...], 0.0)
    y = jnp.dot(x, w_ref[...], preferred_element_type=jnp.float32) + b_ref[...]
    o_ref[...] = jnp.maximum(y, 0.0)


def linear_head(z, w_fc, b_fc):
    bsz, fin = z.shape
    fout = w_fc.shape[-1]
    b_p = _round_up(bsz, 8)
    zp = jnp.pad(z.astype(jnp.float32), ((0, b_p - bsz), (0, 0)))
    out = pl.pallas_call(
        _head_kernel,
        grid=(1,),
        in_specs=[
            pl.BlockSpec((b_p, fin), lambda i: (0, 0)),
            pl.BlockSpec((fin, fout), lambda i: (0, 0)),
            pl.BlockSpec((1, fout), lambda i: (0, 0)),
        ],
        out_specs=pl.BlockSpec((b_p, fout), lambda i: (0, 0)),
        out_shape=jax.ShapeDtypeStruct((b_p, fout), jnp.float32),
    )(zp, w_fc.astype(jnp.float32), b_fc.astype(jnp.float32).reshape(1, fout))
    return out[:bsz]


# --------------------------------------------------------------------------- #
# XLA glue (tiny ops between the Pallas kernels)
# --------------------------------------------------------------------------- #
def _maxpool2d_3x3_s2_p1(x):
    return lax.reduce_window(x, jnp.array(-jnp.inf, x.dtype), lax.max,
                             (1, 1, 3, 3), (1, 1, 2, 2),
                             ((0, 0), (0, 0), (1, 1), (1, 1)))


def fsq_quantize(z):
    levels = jnp.asarray(_FSQ_LEVELS, jnp.float32)
    eps = 1e-3
    half_l = (levels - 1.0) * (1.0 + eps) / 2.0
    offset = jnp.where(levels % 2.0 == 0.0, 0.5, 0.0)
    shift = jnp.arctanh(offset / half_l)
    bounded = jnp.tanh(z + shift) * half_l - offset
    half_width = jnp.floor(levels / 2.0)
    return jnp.round(bounded) / half_width


def _get_coor(batch, height, width):
    hs = (jnp.arange(height, dtype=jnp.float32) / height)[:, None]
    ws = (jnp.arange(width, dtype=jnp.float32) / width)[None, :]
    coor = jnp.stack([jnp.broadcast_to(hs, (height, width)),
                      jnp.broadcast_to(ws, (height, width))], axis=-1)
    return jnp.broadcast_to(coor[None], (batch, height, width, 2))


# --------------------------------------------------------------------------- #
# Model structure (shared by the Pallas path and the lax.conv reference)
# --------------------------------------------------------------------------- #
def _residual_block(x, prm, conv_fn):
    out = conv_fn(x, prm["conv1"]["w"], prm["conv1"]["b"], pre_relu=True)
    out = conv_fn(out, prm["conv2"]["w"], prm["conv2"]["b"], pre_relu=True)
    return out + x


def _impala_block(x, prm, conv_fn):
    x = conv_fn(x, prm["conv"]["w"], prm["conv"]["b"], pre_relu=False)
    x = _maxpool2d_3x3_s2_p1(x)
    x = _residual_block(x, prm["res1"], conv_fn)
    x = _residual_block(x, prm["res2"], conv_fn)
    return x


def _conv_stack(x, params, conv_fn):
    x = _impala_block(x, params["block1"], conv_fn)
    x = _impala_block(x, params["block2"], conv_fn)
    x = _impala_block(x, params["block3"], conv_fn)
    return jnp.maximum(x, 0.0)


def _conv3x3_ref(x, w_hwio, b, *, pre_relu=False):
    if pre_relu:
        x = jnp.maximum(x, 0.0)
    dn = lax.conv_dimension_numbers(x.shape, w_hwio.shape, ("NCHW", "HWIO", "NCHW"))
    y = lax.conv_general_dilated(x, w_hwio, (1, 1), ((1, 1), (1, 1)),
                                 dimension_numbers=dn,
                                 precision=lax.Precision.HIGHEST)
    return y + b.reshape(1, -1, 1, 1)


@functools.partial(jax.jit, static_argnames=("storage_dtype",))
def impala_fsq_forward(x, params, *, storage_dtype=jnp.float32):
    """Full ImpalaFSQModel.forward (use_mha=False).  Returns (output, conv_feats)."""
    conv_fn = functools.partial(conv3x3_same, storage_dtype=storage_dtype)
    feats = _conv_stack(x.astype(storage_dtype), params, conv_fn)      # (B, 3, 8, 8)
    feats_f32 = feats.astype(jnp.float32)

    b, c, h, w = feats.shape
    nhwc = jnp.transpose(feats_f32, (0, 2, 3, 1))                      # permute(0,2,3,1)
    n_ent = h * w
    codes = fsq_quantize(nhwc.reshape(b, n_ent, c))                    # FSQ([8,6,5])
    coor = _get_coor(b, h, w).reshape(b, n_ent, 2)
    z = jnp.concatenate([codes, coor], axis=2)                         # (B, 64, 5)
    # use_mha=False: GlobalSelfAttention skipped.
    z = jnp.max(z, axis=2)                     # MaxPool1d(k=5,s=1) + permute(0,2,1)
    assert z.shape[-1] == params["fc"]["w"].shape[0]
    out = linear_head(z, params["fc"]["w"], params["fc"]["b"])         # ReLU->fc->ReLU
    return out, feats_f32                      # out == (B,1,256).squeeze() for B>1


@jax.jit
def impala_features_ref(x, params):
    """Pure-XLA (lax.conv) reference for the Impala conv stack."""
    return _conv_stack(x, params, _conv3x3_ref)


# --------------------------------------------------------------------------- #
# Deterministic parameter init (HWIO conv weights, (in, out) fc weight)
# --------------------------------------------------------------------------- #
def _conv_init(key, cin, cout):
    kw, kb = jax.random.split(key)
    a = math.sqrt(6.0 / (9 * cin + 9 * cout))
    w = jax.random.uniform(kw, (3, 3, cin, cout), jnp.float32, -a, a)
    bb = 1.0 / math.sqrt(9 * cin)
    b = jax.random.uniform(kb, (cout,), jnp.float32, -bb, bb)
    return {"w": w, "b": b}


def _block_init(key, cin, cout):
    k = jax.random.split(key, 5)
    return {"conv": _conv_init(k[0], cin, cout),
            "res1": {"conv1": _conv_init(k[1], cout, cout),
                     "conv2": _conv_init(k[2], cout, cout)},
            "res2": {"conv1": _conv_init(k[3], cout, cout),
                     "conv2": _conv_init(k[4], cout, cout)}}


def init_params(key, in_channels):
    k1, k2, k3, kfc = jax.random.split(key, 4)
    kfw, kfb = jax.random.split(kfc)
    a = math.sqrt(6.0 / (64 + 256))
    return {
        "block1": _block_init(k1, in_channels, 16 * SCALE),
        "block2": _block_init(k2, 16 * SCALE, 32 * SCALE),
        "block3": _block_init(k3, 32 * SCALE, 3 * SCALE),
        "fc": {"w": jax.random.uniform(kfw, (64, 256), jnp.float32, -a, a),
               "b": jax.random.uniform(kfb, (256,), jnp.float32, -0.125, 0.125)},
    }


if __name__ == "__main__":
    key = jax.random.PRNGKey(0)
    k_x, k_p, k_z = jax.random.split(key, 3)

    # 64x64 input so block3 yields 8x8 = 64 entities, matching fc(in_features=64).
    B, in_channels, H, W = 2, 4, 64, 64
    x = jax.random.normal(k_x, (B, in_channels, H, W), jnp.float32)
    params = init_params(k_p, in_channels)

    # Head kernel micro-check (ReLU -> Linear(64,256) -> ReLU).
    z = jax.random.normal(k_z, (B, 64), jnp.float32)
    head_ref = jnp.maximum(jnp.maximum(z, 0.0) @ params["fc"]["w"] + params["fc"]["b"], 0.0)
    head_out = linear_head(z, params["fc"]["w"], params["fc"]["b"])
    np.testing.assert_allclose(np.asarray(head_out), np.asarray(head_ref),
                               rtol=1e-2, atol=1e-2)

    # f32 storage: full forward; validate the Pallas conv stack vs lax.conv.
    out, feats = jax.block_until_ready(impala_fsq_forward(x, params))
    feats_ref = jax.block_until_ready(impala_features_ref(x, params))
    np.testing.assert_allclose(np.asarray(feats), np.asarray(feats_ref),
                               rtol=2e-2, atol=2e-2)
    assert out.shape == (B, 256), out.shape
    assert bool(jnp.all(jnp.isfinite(out)))

    # bf16 storage: bf16 operands feed the MXU directly (no in-kernel upcast).
    out_bf16, _ = jax.block_until_ready(
        impala_fsq_forward(x, params, storage_dtype=jnp.bfloat16))
    assert out_bf16.shape == (B, 256), out_bf16.shape
    assert bool(jnp.all(jnp.isfinite(out_bf16)))

    print("KERNEL_OK")
</pallas_src>

<mosaic_0001>
module attributes {stable_mosaic.version = 11 : i64} {
  func.func @_head_kernel(%arg0: i32, %arg1: memref<8x64xf32, #tpu.memory_space<vmem>>, %arg2: memref<64x256xf32, #tpu.memory_space<vmem>>, %arg3: memref<1x256xf32, #tpu.memory_space<vmem>>, %arg4: memref<8x256xf32, #tpu.memory_space<vmem>>) attributes {dimension_semantics = [#tpu.dimension_semantics<arbitrary>], iteration_bounds = array<i64: 1>, scalar_prefetch = 0 : i64, scratch_operands = 0 : i64, tpu.core_type = #tpu.core_type<tc>, window_params = [{pipeline_mode = #tpu.pipeline_mode<synchronous>, transform_indices = @transform_0, window_bounds = array<i64: 8, 64>}, {pipeline_mode = #tpu.pipeline_mode<synchronous>, transform_indices = @transform_1, window_bounds = array<i64: 64, 256>}, {pipeline_mode = #tpu.pipeline_mode<synchronous>, transform_indices = @transform_2, window_bounds = array<i64: 1, 256>}, {pipeline_mode = #tpu.pipeline_mode<synchronous>, transform_indices = @transform_3, window_bounds = array<i64: 8, 256>}]} {
    %c0 = arith.constant 0 : index
    %c0_0 = arith.constant 0 : index
    %0 = vector.load %arg1[%c0, %c0_0] : memref<8x64xf32, #tpu.memory_space<vmem>>, vector<8x64xf32>
    %cst = arith.constant 0.000000e+00 : f32
    %1 = vector.broadcast %cst : f32 to vector<8x64xf32>
    %2 = arith.maximumf %0, %1 : vector<8x64xf32>
    %c0_1 = arith.constant 0 : index
    %c0_2 = arith.constant 0 : index
    %3 = vector.load %arg2[%c0_1, %c0_2] : memref<64x256xf32, #tpu.memory_space<vmem>>, vector<64x256xf32>
    %cst_3 = arith.constant dense<0.000000e+00> : vector<8x256xf32>
    %4 = tpu.matmul %2, %3, %cst_3 {dimension_numbers = #tpu.dot_dimension_numbers<[1], [0], [0], [1], [0, 0, 1, 1], [], []>} : vector<8x64xf32>, vector<64x256xf32>, vector<8x256xf32> -> vector<8x256xf32>
    %c0_4 = arith.constant 0 : index
    %c0_5 = arith.constant 0 : index
    %5 = vector.load %arg3[%c0_4, %c0_5] : memref<1x256xf32, #tpu.memory_space<vmem>>, vector<1x256xf32>
    %6 = vector.broadcast %5 : vector<1x256xf32> to vector<8x256xf32>
    %7 = arith.addf %4, %6 : vector<8x256xf32>
    %cst_6 = arith.constant 0.000000e+00 : f32
    %8 = vector.broadcast %cst_6 : f32 to vector<8x256xf32>
    %9 = arith.maximumf %7, %8 : vector<8x256xf32>
    %c0_7 = arith.constant 0 : index
    %c0_8 = arith.constant 0 : index
    %10 = vector.load %arg4[%c0_7, %c0_8] : memref<8x256xf32, #tpu.memory_space<vmem>>, vector<8x256xf32>
    tpu.vector_store %arg4[%c0_7, %c0_8], %9 {strides = array<i32>} : memref<8x256xf32, #tpu.memory_space<vmem>>, vector<8x256xf32>,
    return
  }
  func.func @transform_0(%arg0: i32) -> (i32, i32) {
    %c0_i32 = arith.constant 0 : i32
    %c0_i32_0 = arith.constant 0 : i32
    %c0_i32_1 = arith.constant 0 : i32
    return %c0_i32, %c0_i32_0 : i32, i32
  }
  func.func @transform_1(%arg0: i32) -> (i32, i32) {
    %c0_i32 = arith.constant 0 : i32
    %c0_i32_0 = arith.constant 0 : i32
    %c0_i32_1 = arith.constant 0 : i32
    return %c0_i32, %c0_i32_0 : i32, i32
  }
  func.func @transform_2(%arg0: i32) -> (i32, i32) {
    %c0_i32 = arith.constant 0 : i32
    %c0_i32_0 = arith.constant 0 : i32
    %c0_i32_1 = arith.constant 0 : i32
    return %c0_i32, %c0_i32_0 : i32, i32
  }
  func.func @transform_3(%arg0: i32) -> (i32, i32) {
    %c0_i32 = arith.constant 0 : i32
    %c0_i32_0 = arith.constant 0 : i32
    %c0_i32_1 = arith.constant 0 : i32
    return %c0_i32, %c0_i32_0 : i32, i32
  }
}

</mosaic_0001>

<bundles_post_ra>
// kernel: tpu_custom_call.1
= control target key start
LH: loop header
LB: loop body
LE: loop exit
PB: predicated region body
PF: predicated region fallthrough
CT: control target
= control target key end

     0   :  { %8 = vsyncpa [#allocation3], 0  ;;  %s296_s0 = inlined_call_operand.hbm [shape: f32[8,64], index: 0, kind: input, shape index: {}]   ;;  %s297_s1 = inlined_call_operand.hbm [shape: f32[64,256], index: 1, kind: input, shape index: {}]   ;;  %s298_s2 = inlined_call_operand.hbm [shape: f32[1,256], index: 2, kind: input, shape index: {}]   ;;  %s299_s3 = inlined_call_operand.hbm [shape: f32[8,256], index: 3, kind: output, shape index: {}]  }
   0x1   :  { %9 = vsyncpa [#allocation6], 0  ;;  %s26_s14 = sshll.u32 %s297_s1, 4  ;;  %s27_s14 = int_to_ptr.hbm [resolvable:$true] %s26_s14 }
   0x2   :  { %10 = vsyncpa [#allocation4], 0  ;;  %s258_s15 = smov [#allocation5]   ;;  %s16_s19 = sshll.u32 %s296_s0, 4  ;;  %s17_s19 = int_to_ptr.hbm [resolvable:$true] %s16_s19 }
   0x3   :  { %s28_s16 = sshll.u32 %s258_s15, 4  ;;  %s259_s20 = smov 256   ;;  %s29_s16 = int_to_ptr.vmem [resolvable:$true] %s28_s16 }
   0x4   :  { %s260_s21 = smov 16   ;;  %s261_s22 = smov [#allocation2]  }
   0x5   :  { %34 = dma.hbm_to_vmem [thread:$0]  %s27_s14, 2048, %s29_s16, [#allocation6], %s259_s20, %s259_s20, %s260_s21  }
   0x6   :  { %s18_s23 = sshll.u32 %s261_s22, 4  ;;  %s40_s26 = sshll.u32 %s298_s2, 4  ;;  %s19_s23 = int_to_ptr.vmem [resolvable:$true] %s18_s23  ;;  %s41_s26 = int_to_ptr.hbm [resolvable:$true] %s40_s26 }
   0x7   :  { %21 = dma.hbm_to_vmem [thread:$0]  %s17_s19, 128, %s19_s23, [#allocation3]  }
   0x8   :  { %s262_s1 = smov [#allocation7]  }
   0x9   :  { %s42_s27 = sshll.u32 %s262_s1, 4  ;;  %s43_s27 = int_to_ptr.vmem [resolvable:$true] %s42_s27 }
   0xa   :  { %45 = dma.hbm_to_vmem [thread:$0]  %s41_s26, 32, %s43_s27, [#allocation6]  }
   0xb   :  { %252 = dma.done.wait [#allocation3], 128  }
   0xc   :  { %253 = vsyncadd [#allocation3], 4294967168 }
   0xd   :  { %254 = dma.done.wait [#allocation6], 2080  }
   0xe   :  { %255 = vsyncadd [#allocation6], 4294965216  ;;  %v74_v0 = vld [vmem:[#allocation5 + $0x70] sm:$0xff]  ;;  %v75_v1 = vld [vmem:[#allocation5 + $0x78] sm:$0xff]  ;;  %vm82_vm0 = vcmask 523264   ;;  %s263_s0 = smov [#allocation8]  }
   0xf   :  { %v72_v2 = vld [vmem:[#allocation5 + $0x60] sm:$0xff]  ;;  %94 = vmatpush.msra.mxu0 %v74_v0  ;;  %114 = vmatpush.msra.mxu1 %v75_v1  ;;  %v73_v3 = vld [vmem:[#allocation5 + $0x68] sm:$0xff]  ;;  %v70_v4 = vld [vmem:[#allocation5 + $0x50] sm:$0xff]  ;;  %s135_s2 = sshll.u32 %s263_s0, 4  ;;  %s137_s30 = sshll.u32 %s299_s3, 4  ;;  %s136_s2 = int_to_ptr.vmem [resolvable:$true] %s135_s2  ;;  %s138_s30 = int_to_ptr.hbm [resolvable:$true] %s137_s30 }
  0x10   :  { %v71_v5 = vld [vmem:[#allocation5 + $0x58] sm:$0xff]  ;;  %v68_v6 = vld [vmem:[#allocation5 + $0x40] sm:$0xff]  ;;  %v69_v7 = vld [vmem:[#allocation5 + $0x48] sm:$0xff] }
  0x11   :  { %95 = vmatpush.msra.mxu0 %v72_v2  ;;  %115 = vmatpush.msra.mxu1 %v73_v3  ;;  %v66_v8 = vld [vmem:[#allocation5 + $0x30] sm:$0xff]  ;;  %v67_v9 = vld [vmem:[#allocation5 + $0x38] sm:$0xff]  ;;  %v64_v10 = vld [vmem:[#allocation5 + $0x20] sm:$0xff] }
  0x12   :  { %v65_v11 = vld [vmem:[#allocation5 + $0x28] sm:$0xff]  ;;  %v58_v12 = vld [vmem:[#allocation2] sm:$0xff]  ;;  %v62_v13 = vld [vmem:[#allocation5 + $0x10] sm:$0xff] }
  0x13   :  { %96 = vmatpush.msra.mxu0 %v70_v4  ;;  %116 = vmatpush.msra.mxu1 %v71_v5  ;;  %v63_v14 = vld [vmem:[#allocation5 + $0x18] sm:$0xff]  ;;  %v60_v15 = vld [vmem:[#allocation5] sm:$0xff]  ;;  %v61_v16 = vld [vmem:[#allocation5 + $0x8] sm:$0xff]  ;;  %v59_v17 = vmax.f32 %v58_v12, 0.0 }
  0x14   :  { %v76_v18 = vld [vmem:[#allocation7] sm:$0x3] }
  0x15   :  { %97 = vmatpush.msra.mxu0 %v68_v6  ;;  %117 = vmatpush.msra.mxu1 %v69_v7  ;;  %v78_v19 = vperm.slane %v76_v18, 0  ;;  %v79_v20 = vperm.slane %v76_v18, 1 }
  0x17   :  { %98 = vmatpush.msra.mxu0 %v66_v8  ;;  %118 = vmatpush.msra.mxu1 %v67_v9 }
  0x19   :  { %99 = vmatpush.msra.mxu0 %v64_v10  ;;  %119 = vmatpush.msra.mxu1 %v65_v11 }
  0x1b   :  { %100 = vmatpush.msra.mxu0 %v62_v13  ;;  %120 = vmatpush.msra.mxu1 %v63_v14 }
  0x1d   :  { %101 = vmatpush.msra.mxu0 %v60_v15  ;;  %121 = vmatpush.msra.mxu1 %v61_v16 }
  0x1e   :  { %148 = vmatmul.msk.f32.vlgmr.msra.gmra.mxu0 %vm82_vm0, %v59_v17  ;;  %149 = vmatmul.msk.f32.vlgmr.msra.gmra.mxu1 %vm82_vm0, %v59_v17 }
  0x9b   :  { %v103_v21 = vpop.f32.mrf.mxu0  ;;  %v123_v22 = vpop.f32.mrf.mxu1 }
  0x9c   :  { %v104_v23 = vadd.f32 %v103_v21, %v78_v19  ;;  %v124_v24 = vadd.f32 %v123_v22, %v79_v20 }
  0x9e   :  { %v126_v25 = vmax.f32 %v104_v23, 0.0  ;;  %v127_v26 = vmax.f32 %v124_v24, 0.0 }
  0xa0   :  { %128 = vst [vmem:[#allocation8] sm:$0xff] %v126_v25 }
  0xa1   :  { %129 = vst [vmem:[#allocation8 + $0x8] sm:$0xff] %v127_v26 }
  0xa2   :  { %140 = dma.vmem_to_hbm [thread:$0]  %s136_s2, 256, %s138_s30, [#allocation4]  }
  0xa3   :  { %256 = dma.done.wait [#allocation4], 256  }
  0xa4   :  { %257 = vsyncadd [#allocation4], 4294967040 }
  0xa5   :  { %145 = vsyncpa [#allocation3], 1 }
  0xa6   :  { %146 = vsyncpa [#allocation6], 1 }
  0xa7   :  { %147 = vsyncpa [#allocation4], 1 }

</bundles_post_ra>
